<compile_context>
chip_gen: v7x
topology: tpu7x:2x2x1
jax: 0.10.0
libtpu: 0.0.40
codegen_flags: <defaults>
</compile_context>

<pallas_src>
import jax
import jax.numpy as jnp
from jax.experimental import pallas as pl
from jax.experimental.pallas import tpu as pltpu

IN_DIM = 28 * 28          # 784
HIDDEN = 100
N_CLASSES = 10
HIDDEN_PAD = 128          # lane-aligned hidden width
OUT_PAD = 128             # lane-dense output / logits width
NEG_BIG = -1e30           # mask value for padded logits


def _round_up(x, m):
    return ((x + m - 1) // m) * m


def mlp_kernel(x_ref, w1_ref, b1_ref, w2_ref, b2_ref, o_ref):
    # Cast the streamed f32 x block to bf16 in-register, right before the MXU
    # (no extra HBM pass for a bf16 copy of x).
    xb = x_ref[...].astype(jnp.bfloat16)
    # fc1: (TB,784)bf16 @ (784,128)bf16 -> f32 accumulate on the MXU
    z1 = jnp.dot(xb, w1_ref[...], preferred_element_type=jnp.float32)
    z1 = z1 + b1_ref[...]
    # sigmoid: exp + vrcp both ride the EUP slot (no VPU divide)
    h = pl.reciprocal(1.0 + jnp.exp(-z1), approx=True)
    # fc2: bf16 x bf16 MXU matmul with f32 accumulation.
    # Padded hidden rows of W2 are exactly zero, so h=0.5 on padded columns
    # contributes nothing (keep that invariant!).
    logits = jnp.dot(h.astype(jnp.bfloat16), w2_ref[...],
                     preferred_element_type=jnp.float32)
    logits = logits + b2_ref[...]           # padded classes carry -1e30 bias
    # numerically-stable softmax over the (lane-dense) last axis
    m = jnp.max(logits, axis=-1, keepdims=True)
    e = jnp.exp(logits - m)                 # exp(-1e30 - m) underflows to 0
    denom = jnp.sum(e, axis=-1, keepdims=True)
    # exact normalization (cheap; kernel is HBM-bound), then bf16 store
    o_ref[...] = (e / denom).astype(o_ref.dtype)


def prepare_params(w1, b1, w2, b2):
    """One-time prep of PyTorch nn.Linear params (w1:(100,784) b1:(100,)
    w2:(10,100) b2:(10,)) into padded/transposed kernel layout."""
    w1_t = jnp.zeros((IN_DIM, HIDDEN_PAD), jnp.bfloat16)
    w1_t = w1_t.at[:, :HIDDEN].set(w1.T.astype(jnp.bfloat16))
    b1_p = jnp.zeros((1, HIDDEN_PAD), jnp.float32).at[:, :HIDDEN].set(b1)
    # W2 in bf16; padded hidden rows MUST stay exactly zero (see kernel note).
    w2_t = jnp.zeros((HIDDEN_PAD, OUT_PAD), jnp.bfloat16)
    w2_t = w2_t.at[:HIDDEN, :N_CLASSES].set(w2.T.astype(jnp.bfloat16))
    b2_p = jnp.full((1, OUT_PAD), NEG_BIG, jnp.float32).at[:, :N_CLASSES].set(b2)
    return w1_t, b1_p, w2_t, b2_p


def _pick_tile(B, tile_b):
    # >= 2 grid steps (v7x megacore sharding + keeps the DMA pipeline active),
    # tile a multiple of 16 (bf16 output sublane pack factor 2).
    tb = _round_up(max(B // 2, 1), 16)
    tb = min(tb, _round_up(tile_b, 16))
    return max(tb, 16)


def net_forward(x_nchw, params, *, tile_b=1024):
    """x_nchw: (B,1,28,28) f32.  params: output of prepare_params().
    Returns (B,10) softmax probabilities (bf16)."""
    w1_t, b1_p, w2_t, b2_p = params
    B = x_nchw.shape[0]
    x = x_nchw.reshape(B, IN_DIM)          # x.view(-1, 784); stays f32, no copy

    tb = _pick_tile(B, tile_b)
    b_pad = _round_up(B, tb)
    if b_pad != B:                          # only materializes when tb doesn't divide B
        x = jnp.pad(x, ((0, b_pad - B), (0, 0)))

    grid = (b_pad // tb,)

    cost = pl.CostEstimate(
        flops=2 * b_pad * IN_DIM * HIDDEN_PAD + 2 * b_pad * HIDDEN_PAD * OUT_PAD,
        transcendentals=2 * b_pad * HIDDEN_PAD,          # sigmoid exp + softmax exp
        bytes_accessed=(b_pad * IN_DIM * 4               # x (f32, streamed)
                        + IN_DIM * HIDDEN_PAD * 2        # W1 (bf16)
                        + HIDDEN_PAD * OUT_PAD * 2       # W2 (bf16)
                        + (HIDDEN_PAD + OUT_PAD) * 4     # biases (f32)
                        + b_pad * OUT_PAD * 2),          # output (bf16)
    )

    out = pl.pallas_call(
        mlp_kernel,
        out_shape=jax.ShapeDtypeStruct((b_pad, OUT_PAD), jnp.bfloat16),
        grid=grid,
        in_specs=[
            pl.BlockSpec((tb, IN_DIM), lambda i: (i, 0)),            # x: streamed per tile
            pl.BlockSpec((IN_DIM, HIDDEN_PAD), lambda i: (0, 0)),    # W1: resident
            pl.BlockSpec((1, HIDDEN_PAD), lambda i: (0, 0)),         # b1: resident
            pl.BlockSpec((HIDDEN_PAD, OUT_PAD), lambda i: (0, 0)),   # W2: resident
            pl.BlockSpec((1, OUT_PAD), lambda i: (0, 0)),            # b2: resident
        ],
        out_specs=pl.BlockSpec((tb, OUT_PAD), lambda i: (i, 0)),
        compiler_params=pltpu.CompilerParams(
            dimension_semantics=("parallel",),
            vmem_limit_bytes=32 * 1024 * 1024),
        cost_estimate=cost,
    )(x, w1_t, b1_p, w2_t, b2_p)

    return out[:B, :N_CLASSES]


def _init_params(key):
    # Deterministic init mimicking nn.Linear default: U(-1/sqrt(fan_in), 1/sqrt(fan_in)).
    k1, k2, k3, k4 = jax.random.split(key, 4)
    lim1 = 1.0 / jnp.sqrt(784.0)
    lim2 = 1.0 / jnp.sqrt(100.0)
    w1 = jax.random.uniform(k1, (HIDDEN, IN_DIM), jnp.float32, -lim1, lim1)
    b1 = jax.random.uniform(k2, (HIDDEN,), jnp.float32, -lim1, lim1)
    w2 = jax.random.uniform(k3, (N_CLASSES, HIDDEN), jnp.float32, -lim2, lim2)
    b2 = jax.random.uniform(k4, (N_CLASSES,), jnp.float32, -lim2, lim2)
    return w1, b1, w2, b2


if __name__ == "__main__":
    key = jax.random.PRNGKey(0)
    kx, kp = jax.random.split(key)
    B = 2
    x = jax.random.normal(kx, (B, 1, 28, 28), jnp.float32)  # NCHW MNIST-shaped input
    w1, b1, w2, b2 = _init_params(kp)

    params = prepare_params(w1, b1, w2, b2)                  # hoisted one-time prep
    out = jax.block_until_ready(net_forward(x, params))
    out_f32 = out.astype(jnp.float32)

    # Reference matching the kernel's bf16 matmul operands (f32 accumulate),
    # sigmoid/softmax in f32.
    x_flat = x.reshape(B, -1)
    z1 = jnp.dot(x_flat.astype(jnp.bfloat16), w1.T.astype(jnp.bfloat16),
                 preferred_element_type=jnp.float32) + b1
    h_ref = jax.nn.sigmoid(z1)
    logits_ref = jnp.dot(h_ref.astype(jnp.bfloat16), w2.T.astype(jnp.bfloat16),
                         preferred_element_type=jnp.float32) + b2
    ref = jax.nn.softmax(logits_ref, axis=1)

    assert out.shape == (B, N_CLASSES)
    assert jnp.allclose(out_f32, ref, atol=4e-3, rtol=4e-3), "mismatch vs reference"
    # bf16 output quantization bounds the row-sum drift to ~5e-3.
    assert jnp.allclose(jnp.sum(out_f32, axis=1), 1.0, atol=1e-2), "softmax rows must sum to 1"

    print("KERNEL_OK")
</pallas_src>

<mosaic_0001>
module attributes {stable_mosaic.version = 11 : i64} {
  func.func @mlp_kernel(%arg0: i32, %arg1: memref<16x784xf32, #tpu.memory_space<vmem>>, %arg2: memref<784x128xbf16, #tpu.memory_space<vmem>>, %arg3: memref<1x128xf32, #tpu.memory_space<vmem>>, %arg4: memref<128x128xbf16, #tpu.memory_space<vmem>>, %arg5: memref<1x128xf32, #tpu.memory_space<vmem>>, %arg6: memref<16x128xbf16, #tpu.memory_space<vmem>>) attributes {dimension_semantics = [#tpu.dimension_semantics<parallel>], iteration_bounds = array<i64: 1>, scalar_prefetch = 0 : i64, scratch_operands = 0 : i64, tpu.core_type = #tpu.core_type<tc>, window_params = [{transform_indices = @transform_0, window_bounds = array<i64: 16, 784>}, {pipeline_mode = #tpu.pipeline_mode<synchronous>, transform_indices = @transform_1, window_bounds = array<i64: 784, 128>}, {pipeline_mode = #tpu.pipeline_mode<synchronous>, transform_indices = @transform_2, window_bounds = array<i64: 1, 128>}, {pipeline_mode = #tpu.pipeline_mode<synchronous>, transform_indices = @transform_3, window_bounds = array<i64: 128, 128>}, {pipeline_mode = #tpu.pipeline_mode<synchronous>, transform_indices = @transform_4, window_bounds = array<i64: 1, 128>}, {transform_indices = @transform_5, window_bounds = array<i64: 16, 128>}]} {
    %c0 = arith.constant 0 : index
    %c0_0 = arith.constant 0 : index
    %0 = vector.load %arg1[%c0, %c0_0] : memref<16x784xf32, #tpu.memory_space<vmem>>, vector<16x784xf32>
    %1 = arith.truncf %0 : vector<16x784xf32> to vector<16x784xbf16>
    %c0_1 = arith.constant 0 : index
    %c0_2 = arith.constant 0 : index
    %2 = vector.load %arg2[%c0_1, %c0_2] : memref<784x128xbf16, #tpu.memory_space<vmem>>, vector<784x128xbf16>
    %cst = arith.constant dense<0.000000e+00> : vector<16x128xf32>
    %3 = tpu.matmul %1, %2, %cst {dimension_numbers = #tpu.dot_dimension_numbers<[1], [0], [0], [1], [0, 0, 1, 1], [], []>} : vector<16x784xbf16>, vector<784x128xbf16>, vector<16x128xf32> -> vector<16x128xf32>
    %c0_3 = arith.constant 0 : index
    %c0_4 = arith.constant 0 : index
    %4 = vector.load %arg3[%c0_3, %c0_4] : memref<1x128xf32, #tpu.memory_space<vmem>>, vector<1x128xf32>
    %5 = vector.broadcast %4 : vector<1x128xf32> to vector<16x128xf32>
    %6 = arith.addf %3, %5 : vector<16x128xf32>
    %cst_5 = arith.constant 0.000000e+00 : f32
    %7 = vector.broadcast %cst_5 : f32 to vector<16x128xf32>
    %8 = arith.subf %7, %6 : vector<16x128xf32>
    %9 = math.exp %8 : vector<16x128xf32>
    %cst_6 = arith.constant 1.000000e+00 : f32
    %10 = vector.broadcast %cst_6 : f32 to vector<16x128xf32>
    %11 = arith.addf %10, %9 : vector<16x128xf32>
    %12 = tpu.reciprocal %11 {approx = true} : vector<16x128xf32> -> vector<16x128xf32>
    %13 = arith.truncf %12 : vector<16x128xf32> to vector<16x128xbf16>
    %c0_7 = arith.constant 0 : index
    %c0_8 = arith.constant 0 : index
    %14 = vector.load %arg4[%c0_7, %c0_8] : memref<128x128xbf16, #tpu.memory_space<vmem>>, vector<128x128xbf16>
    %cst_9 = arith.constant dense<0.000000e+00> : vector<16x128xf32>
    %15 = tpu.matmul %13, %14, %cst_9 {dimension_numbers = #tpu.dot_dimension_numbers<[1], [0], [0], [1], [0, 0, 1, 1], [], []>} : vector<16x128xbf16>, vector<128x128xbf16>, vector<16x128xf32> -> vector<16x128xf32>
    %c0_10 = arith.constant 0 : index
    %c0_11 = arith.constant 0 : index
    %16 = vector.load %arg5[%c0_10, %c0_11] : memref<1x128xf32, #tpu.memory_space<vmem>>, vector<1x128xf32>
    %17 = vector.broadcast %16 : vector<1x128xf32> to vector<16x128xf32>
    %18 = arith.addf %15, %17 : vector<16x128xf32>
    %cst_12 = arith.constant dense<0xFF800000> : vector<16xf32>
    %19 = vector.multi_reduction <maximumf>, %18, %cst_12 [1] : vector<16x128xf32> to vector<16xf32>
    %20 = vector.shape_cast %19 : vector<16xf32> to vector<16x1xf32>
    %21 = vector.broadcast %20 : vector<16x1xf32> to vector<16x128xf32>
    %22 = arith.subf %18, %21 : vector<16x128xf32>
    %23 = math.exp %22 : vector<16x128xf32>
    %cst_13 = arith.constant dense<0.000000e+00> : vector<16xf32>
    %24 = vector.multi_reduction <add>, %23, %cst_13 [1] : vector<16x128xf32> to vector<16xf32>
    %25 = vector.shape_cast %24 : vector<16xf32> to vector<16x1xf32>
    %26 = vector.broadcast %25 : vector<16x1xf32> to vector<16x128xf32>
    %27 = arith.divf %23, %26 : vector<16x128xf32>
    %28 = arith.truncf %27 : vector<16x128xf32> to vector<16x128xbf16>
    %c0_14 = arith.constant 0 : index
    %c0_15 = arith.constant 0 : index
    %29 = vector.load %arg6[%c0_14, %c0_15] : memref<16x128xbf16, #tpu.memory_space<vmem>>, vector<16x128xbf16>
    tpu.vector_store %arg6[%c0_14, %c0_15], %28 {strides = array<i32>} : memref<16x128xbf16, #tpu.memory_space<vmem>>, vector<16x128xbf16>,
    return
  }
  func.func @transform_0(%arg0: i32) -> (i32, i32) {
    %c0_i32 = arith.constant 0 : i32
    %c0_i32_0 = arith.constant 0 : i32
    return %arg0, %c0_i32 : i32, i32
  }
  func.func @transform_1(%arg0: i32) -> (i32, i32) {
    %c0_i32 = arith.constant 0 : i32
    %c0_i32_0 = arith.constant 0 : i32
    %c0_i32_1 = arith.constant 0 : i32
    return %c0_i32, %c0_i32_0 : i32, i32
  }
  func.func @transform_2(%arg0: i32) -> (i32, i32) {
    %c0_i32 = arith.constant 0 : i32
    %c0_i32_0 = arith.constant 0 : i32
    %c0_i32_1 = arith.constant 0 : i32
    return %c0_i32, %c0_i32_0 : i32, i32
  }
  func.func @transform_3(%arg0: i32) -> (i32, i32) {
    %c0_i32 = arith.constant 0 : i32
    %c0_i32_0 = arith.constant 0 : i32
    %c0_i32_1 = arith.constant 0 : i32
    return %c0_i32, %c0_i32_0 : i32, i32
  }
  func.func @transform_4(%arg0: i32) -> (i32, i32) {
    %c0_i32 = arith.constant 0 : i32
    %c0_i32_0 = arith.constant 0 : i32
    %c0_i32_1 = arith.constant 0 : i32
    return %c0_i32, %c0_i32_0 : i32, i32
  }
  func.func @transform_5(%arg0: i32) -> (i32, i32) {
    %c0_i32 = arith.constant 0 : i32
    %c0_i32_0 = arith.constant 0 : i32
    return %arg0, %c0_i32 : i32, i32
  }
}

</mosaic_0001>

<bundles_post_ra>
// kernel: tpu_custom_call.1
= control target key start
LH: loop header
LB: loop body
LE: loop exit
PB: predicated region body
PF: predicated region fallthrough
CT: control target
= control target key end

     0   :  { %10 = vsyncpa [#allocation3], 0  ;;  %s1285_s0 = inlined_call_operand.hbm [shape: f32[16,784], index: 0, kind: input, shape index: {}]   ;;  %s1286_s1 = inlined_call_operand.hbm [shape: bf16[784,128], index: 1, kind: input, shape index: {}]   ;;  %s1287_s2 = inlined_call_operand.vmem [shape: f32[1,128], index: 2, kind: input, shape index: {}]   ;;  %s1288_s3 = inlined_call_operand.hbm [shape: bf16[128,128], index: 3, kind: input, shape index: {}]   ;;  %s1289_s4 = inlined_call_operand.vmem [shape: f32[1,128], index: 4, kind: input, shape index: {}]   ;;  %s1290_s5 = inlined_call_operand.hbm [shape: bf16[16,128], index: 5, kind: output, shape index: {}]  }
   0x1   :  { %11 = vsyncpa [#allocation6], 0 }
   0x2   :  { %12 = vsyncpa [#allocation4], 0  ;;  %s1169_s18 = smov [#allocation5]   ;;  %s1075_s22 = scalar_lea.hbm %s1286_s1, 6272 }
   0x3   :  { %s30_s19 = sshll.u32 %s1169_s18, 4  ;;  %p1076_p0 = scmp.ne.s32.totalorder %s1286_s1, %s1075_s22  ;;  %s31_s19 = int_to_ptr.vmem [resolvable:$true] %s30_s19 }
   0x4   :  { %p1079_p1 = scmp.lt.u32.totalorder %s1075_s22, %s1286_s1 }
   0x6   :  { %p1081_p2 = pnand %p1079_p1, %p1076_p0 }
   0x8   :  { %1084 = shalt.err (!%p1081_p2)
}
   0x9   :  { %s1085_s27 = scalar_lea.vmem %s31_s19, 6272  ;;  %p1090_p4 = scmp.lt.s32.totalorder %s31_s19, %s31_s19 }
   0xa   :  { %p1086_p3 = scmp.ne.s32.totalorder %s31_s19, %s1085_s27  ;;  %p1091_p5 = scmp.lt.s32.totalorder %s1085_s27, %s1085_s27 }
   0xc   :  { %p1092_p6 = por %p1091_p5, %p1090_p4 }
   0xe   :  { %p1093_p7 = pnand %p1092_p6, %p1086_p3 }
  0x10   :  { %1096 = shalt.err (!%p1093_p7)
}
  0x11   :  { %s1170_s28 = smov 64   ;;  %s1171_s29 = smov 4  }
  0x12   :  { %36 = dma.hbm_to_vmem [thread:$0]  %s1286_s1, 6272, %s31_s19, [#allocation6], %s1170_s28, %s1170_s28, %s1171_s29  }
  0x13   :  { %s1172_s7 = smov [#allocation2]   ;;  %s1097_s11 = scalar_lea.hbm %s1285_s0, 1792 }
  0x14   :  { %s18_s8 = sshll.u32 %s1172_s7, 4  ;;  %p1098_p8 = scmp.ne.s32.totalorder %s1285_s0, %s1097_s11  ;;  %s19_s8 = int_to_ptr.vmem [resolvable:$true] %s18_s8 }
  0x15   :  { %p1101_p9 = scmp.lt.u32.totalorder %s1097_s11, %s1285_s0 }
  0x17   :  { %p1103_p10 = pnand %p1101_p9, %p1098_p8 }
  0x19   :  { %1106 = shalt.err (!%p1103_p10)
}
  0x1a   :  { %s1107_s16 = scalar_lea.vmem %s19_s8, 1792  ;;  %p1112_p12 = scmp.lt.s32.totalorder %s19_s8, %s19_s8 }
  0x1b   :  { %p1108_p11 = scmp.ne.s32.totalorder %s19_s8, %s1107_s16  ;;  %p1113_p13 = scmp.lt.s32.totalorder %s1107_s16, %s1107_s16 }
  0x1d   :  { %p1114_p0 = por %p1113_p13, %p1112_p12 }
  0x1f   :  { %p1115_p1 = pnand %p1114_p0, %p1108_p11 }
  0x21   :  { %1118 = shalt.err (!%p1115_p1)
}
  0x22   :  { %s1173_s1 = smov 896   ;;  %s1174_s17 = smov 56  }
  0x23   :  { %24 = dma.hbm_to_vmem [thread:$0]  %s1285_s0, 1792, %s19_s8, [#allocation3], %s1173_s1, %s1173_s1, %s1174_s17  }
  0x24   :  { %s1175_s20 = smov [#allocation7]   ;;  %s1119_s24 = scalar_lea.hbm %s1288_s3, 1024 }
  0x25   :  { %s44_s21 = sshll.u32 %s1175_s20, 4  ;;  %p1120_p2 = scmp.ne.s32.totalorder %s1288_s3, %s1119_s24  ;;  %s45_s21 = int_to_ptr.vmem [resolvable:$true] %s44_s21 }
  0x26   :  { %p1123_p3 = scmp.lt.u32.totalorder %s1119_s24, %s1288_s3 }
  0x28   :  { %p1125_p4 = pnand %p1123_p3, %p1120_p2 }
  0x2a   :  { %1128 = shalt.err (!%p1125_p4)
}
  0x2b   :  { %s1129_s6 = scalar_lea.vmem %s45_s21, 1024  ;;  %p1134_p6 = scmp.lt.s32.totalorder %s45_s21, %s45_s21 }
  0x2c   :  { %p1130_p5 = scmp.ne.s32.totalorder %s45_s21, %s1129_s6  ;;  %p1135_p7 = scmp.lt.s32.totalorder %s1129_s6, %s1129_s6 }
  0x2e   :  { %p1136_p8 = por %p1135_p7, %p1134_p6 }
  0x30   :  { %p1137_p9 = pnand %p1136_p8, %p1130_p5 }
  0x32   :  { %1140 = shalt.err (!%p1137_p9)
}
  0x33   :  { %50 = dma.hbm_to_vmem [thread:$0]  %s1288_s3, 1024, %s45_s21, [#allocation6], %s1170_s28, %s1170_s28, %s1171_s29  }
  0x34   :  { %1163 = dma.done.wait [#allocation3], 1792  }
  0x35   :  { %1164 = vsyncadd [#allocation3], 4294965504 }
  0x36   :  { %1165 = dma.done.wait [#allocation6], 7296  }
  0x37   :  { %1166 = vsyncadd [#allocation6], 4294960000  ;;  %v1002_v0 = vld [vmem:[#allocation5 + $0x40] sm:$0xff]   ;;  %v1006_v4 = vld [vmem:[#allocation5 + $0x48] sm:$0xff]   ;;  %v1176_v43 = vmov 0.0   ;;  %vm1177_vm0 = vmmov 0  }
  0x38   :  { %v1003_v1 = vld [vmem:[#allocation5] sm:$0xff]   ;;  %889 = vmatprep.subr.bf16.mxu0 %v1002_v0  ;;  %v1007_v5 = vld [vmem:[#allocation5 + $0x8] sm:$0xff]   ;;  %v1010_v8 = vld [vmem:[#allocation5 + $0x50] sm:$0xff]   ;;  %vm483_vm1 = vcmask 130048  }
  0x39   :  { %v1004_v2 = vld [vmem:[#allocation5 + $0xc0] sm:$0xff]   ;;  %890 = vmatpush3.bf16.msra.mxu0 %v1003_v1  ;;  %v1008_v6 = vld [vmem:[#allocation5 + $0xc8] sm:$0xff]   ;;  %v1011_v9 = vld [vmem:[#allocation5 + $0x10] sm:$0xff]  }
  0x3a   :  { %v1005_v3 = vld [vmem:[#allocation5 + $0x80] sm:$0xff]   ;;  %911 = vmatprep.subr.bf16.mxu1 %v1004_v2  ;;  %891 = vmatprep.subr.bf16.mxu0 %v1006_v4  ;;  %v1009_v7 = vld [vmem:[#allocation5 + $0x88] sm:$0xff]   ;;  %v1012_v10 = vld [vmem:[#allocation5 + $0xd0] sm:$0xff]  }
  0x3b   :  { %912 = vmatpush3.bf16.msra.mxu1 %v1005_v3  ;;  %v1013_v11 = vld [vmem:[#allocation5 + $0x90] sm:$0xff]   ;;  %v1014_v12 = vld [vmem:[#allocation5 + $0x58] sm:$0xff]   ;;  %v1018_v16 = vld [vmem:[#allocation5 + $0x60] sm:$0xff]  }
  0x3c   :  { %913 = vmatprep.subr.bf16.mxu1 %v1008_v6  ;;  %v1015_v13 = vld [vmem:[#allocation5 + $0x18] sm:$0xff]   ;;  %v1019_v17 = vld [vmem:[#allocation5 + $0x20] sm:$0xff]   ;;  %v1022_v20 = vld [vmem:[#allocation5 + $0x68] sm:$0xff]  }
  0x3d   :  { %892 = vmatpush3.bf16.msra.mxu0 %v1007_v5  ;;  %v1016_v14 = vld [vmem:[#allocation5 + $0xd8] sm:$0xff]   ;;  %v1020_v18 = vld [vmem:[#allocation5 + $0xe0] sm:$0xff]   ;;  %v1023_v21 = vld [vmem:[#allocation5 + $0x28] sm:$0xff]  }
  0x3e   :  { %893 = vmatprep.subr.bf16.mxu0 %v1010_v8  ;;  %v1017_v15 = vld [vmem:[#allocation5 + $0x98] sm:$0xff]   ;;  %v1021_v19 = vld [vmem:[#allocation5 + $0xa0] sm:$0xff]   ;;  %v1024_v22 = vld [vmem:[#allocation5 + $0xe8] sm:$0xff]  }
  0x3f   :  { %914 = vmatpush3.bf16.msra.mxu1 %v1009_v7  ;;  %v1025_v23 = vld [vmem:[#allocation5 + $0xa8] sm:$0xff]   ;;  %v1026_v24 = vld [vmem:[#allocation5 + $0x70] sm:$0xff]   ;;  %v1030_v28 = vld [vmem:[#allocation5 + $0x78] sm:$0xff]  }
  0x40   :  { %915 = vmatprep.subr.bf16.mxu1 %v1012_v10  ;;  %v1027_v25 = vld [vmem:[#allocation5 + $0x30] sm:$0xff]   ;;  %v1031_v29 = vld [vmem:[#allocation5 + $0x38] sm:$0xff]   ;;  %v70_v36 = vld [vmem:[#allocation2 + $0x38] sm:$0xff] }
  0x41   :  { %894 = vmatpush3.bf16.msra.mxu0 %v1011_v9  ;;  %v1028_v26 = vld [vmem:[#allocation5 + $0xf0] sm:$0xff]   ;;  %v1032_v30 = vld [vmem:[#allocation5 + $0xf8] sm:$0xff]   ;;  %v1034_v38 = vld [vmem:[#allocation5 + $0x140] sm:$0xff]  }
  0x42   :  { %895 = vmatprep.subr.bf16.mxu0 %v1014_v12  ;;  %v1029_v27 = vld [vmem:[#allocation5 + $0xb0] sm:$0xff]   ;;  %v64_v31 = vld [vmem:[#allocation2 + $0x8] sm:$0xff]  ;;  %v66_v39 = vld [vmem:[#allocation2 + $0x18] sm:$0xff] }
  0x43   :  { %916 = vmatpush3.bf16.msra.mxu1 %v1013_v11  ;;  %v71_v32 = vld [vmem:[#allocation2 + $0x40] sm:$0xff]  ;;  %v1033_v34 = vld [vmem:[#allocation5 + $0xb8] sm:$0xff]   ;;  %v73_v40 = vld [vmem:[#allocation2 + $0x50] sm:$0xff] }
  0x44   :  { %917 = vmatprep.subr.bf16.mxu1 %v1016_v14  ;;  %v78_v33 = vpack.c.bf16 %v71_v32, %v64_v31  ;;  %v63_v35 = vld [vmem:[#allocation2] sm:$0xff]  ;;  %v80_v41 = vpack.c.bf16 %v73_v40, %v66_v39  ;;  %v1035_v42 = vld [vmem:[#allocation5 + $0x100] sm:$0xff]   ;;  %v72_v45 = vld [vmem:[#allocation2 + $0x48] sm:$0xff] }
  0x45   :  { %896 = vmatpush3.bf16.msra.mxu0 %v1015_v13  ;;  %v77_v37 = vpack.c.bf16 %v70_v36, %v63_v35  ;;  %v65_v44 = vld [vmem:[#allocation2 + $0x10] sm:$0xff]  ;;  %v1036_v47 = vld [vmem:[#allocation5 + $0x148] sm:$0xff]   ;;  %v1038_v49 = vld [vmem:[#allocation5 + $0x150] sm:$0xff]  }
  0x46   :  { %897 = vmatprep.subr.bf16.mxu0 %v1018_v16  ;;  %519 = vmatprep.mubr.bf16.mxu0 %v78_v33  ;;  %v79_v46 = vpack.c.bf16 %v72_v45, %v65_v44  ;;  %v1037_v48 = vld [vmem:[#allocation5 + $0x108] sm:$0xff]   ;;  %v1039_v50 = vld [vmem:[#allocation5 + $0x110] sm:$0xff]   ;;  %v1040_v51 = vld [vmem:[#allocation5 + $0x158] sm:$0xff]  }
  0x47   :  { %918 = vmatpush3.bf16.msra.mxu1 %v1017_v15  ;;  %560 = vmatprep.mubr.bf16.mxu1 %v80_v41  ;;  %v1041_v52 = vld [vmem:[#allocation5 + $0x118] sm:$0xff]   ;;  %v1042_v53 = vld [vmem:[#allocation5 + $0x160] sm:$0xff]   ;;  %v1044_v55 = vld [vmem:[#allocation5 + $0x168] sm:$0xff]  }
  0x48   :  { %919 = vmatprep.subr.bf16.mxu1 %v1020_v18  ;;  %v1043_v54 = vld [vmem:[#allocation5 + $0x120] sm:$0xff]   ;;  %v68_v57 = vld [vmem:[#allocation2 + $0x28] sm:$0xff]  ;;  %v1045_v58 = vld [vmem:[#allocation5 + $0x128] sm:$0xff]  }
  0x49   :  { %898 = vmatpush3.bf16.msra.mxu0 %v1019_v17  ;;  %v1050_v56 = vld [vmem:[#allocation5 + $0x180] sm:$0xff]   ;;  %v1046_v59 = vld [vmem:[#allocation5 + $0x170] sm:$0xff]   ;;  %v76_v63 = vld [vmem:[#allocation2 + $0x68] sm:$0xff] }
  0x4a   :  { %899 = vmatprep.subr.bf16.mxu0 %v1022_v20  ;;  %v75_v60 = vld [vmem:[#allocation2 + $0x60] sm:$0xff]  ;;  %v69_v62 = vld [vmem:[#allocation2 + $0x30] sm:$0xff]  ;;  %v1048_v2 = vld [vmem:[#allocation5 + $0x178] sm:$0xff]  }
  0x4b   :  { %920 = vmatpush3.bf16.msra.mxu1 %v1021_v19  ;;  %v82_v61 = vpack.c.bf16 %v75_v60, %v68_v57  ;;  %v83_v0 = vpack.c.bf16 %v76_v63, %v69_v62  ;;  %v1047_v1 = vld [vmem:[#allocation5 + $0x130] sm:$0xff]   ;;  %v1049_v3 = vld [vmem:[#allocation5 + $0x138] sm:$0xff]   ;;  %v74_v5 = vld [vmem:[#allocation2 + $0x58] sm:$0xff] }
  0x4c   :  { %921 = vmatprep.subr.bf16.mxu1 %v1024_v22  ;;  %v67_v4 = vld [vmem:[#allocation2 + $0x20] sm:$0xff]  ;;  %v1051_v7 = vld [vmem:[#allocation7] sm:$0xff]   ;;  %v1053_v9 = vld [vmem:[#allocation7 + $0x10] sm:$0xff]  }
  0x4d   :  { %900 = vmatpush3.bf16.msra.mxu0 %v1023_v21  ;;  %v81_v6 = vpack.c.bf16 %v74_v5, %v67_v4  ;;  %v1052_v8 = vld [vmem:[#allocation7 + $0x8] sm:$0xff]   ;;  %v1054_v10 = vld [vmem:[#allocation7 + $0x18] sm:$0xff]   ;;  %v1055_v11 = vld [vmem:[#allocation7 + $0x20] sm:$0xff]  }
  0x4e   :  { %901 = vmatprep.subr.bf16.mxu0 %v1026_v24  ;;  %v1056_v12 = vld [vmem:[#allocation7 + $0x28] sm:$0xff]   ;;  %v1057_v13 = vld [vmem:[#allocation7 + $0x30] sm:$0xff]   ;;  %v1058_v14 = vld [vmem:[#allocation7 + $0x38] sm:$0xff]  }
  0x4f   :  { %922 = vmatpush3.bf16.msra.mxu1 %v1025_v23  ;;  %v820_v16 = vld [vmem:[%s1287_s2] ss:$0 sm:$0xff] }
  0x50   :  { %923 = vmatprep.subr.bf16.mxu1 %v1028_v26  ;;  %v871_v57 = vld [vmem:[%s1289_s4] ss:$0 sm:$0xff]  ;;  %s1178_s4 = smov [#allocation8]  }
  0x51   :  { %902 = vmatpush3.bf16.msra.mxu0 %v1027_v25  ;;  %s807_s10 = sshll.u32 %s1178_s4, 4  ;;  %s808_s10 = int_to_ptr.vmem [resolvable:$true] %s807_s10 }
  0x52   :  { %903 = vmatprep.subr.bf16.mxu0 %v1030_v28  ;;  %s1141_s11 = scalar_lea.vmem %s808_s10, 128  ;;  %p1146_p11 = scmp.lt.s32.totalorder %s808_s10, %s808_s10 }
  0x53   :  { %924 = vmatpush3.bf16.msra.mxu1 %v1029_v27  ;;  %p1142_p10 = scmp.ne.s32.totalorder %s808_s10, %s1141_s11  ;;  %p1147_p12 = scmp.lt.s32.totalorder %s1141_s11, %s1141_s11 }
  0x54   :  { %925 = vmatprep.subr.bf16.mxu1 %v1032_v30 }
  0x55   :  { %904 = vmatpush3.bf16.msra.mxu0 %v1031_v29  ;;  %p1148_p13 = por %p1147_p12, %p1146_p11 }
  0x56   :  { %933 = vmatprep.subr.bf16.mxu0 %v1034_v38 }
  0x57   :  { %926 = vmatpush3.bf16.msra.mxu1 %v1033_v34  ;;  %p1149_p0 = pnand %p1148_p13, %p1142_p10 }
  0x58   :  { %966 = vmatprep.subr.bf16.mxu1 %v1176_v43  ;;  %520 = vmatmul.mubr.bf16.vlgmr.msra.gmra.mrb[0].mxu0 %v77_v37 }
  0x59   :  { %934 = vmatpush3.bf16.msra.mxu0 %v1035_v42  ;;  %601 = vmatprep.mubr.bf16.mxu0 %v82_v61 }
  0x5a   :  { %561 = vmatmul.mubr.bf16.vlgmr.msra.gmra.mrb[0].mxu1 %v79_v46  ;;  %935 = vmatprep.subr.bf16.mxu0 %v1036_v47 }
  0x5b   :  { %968 = vmatprep.mubr.msk.bf16.mxu1 %vm1177_vm0, %v1176_v43  ;;  %967 = vmatpush3.bf16.msra.mxu1 %v1050_v56 }
  0x5c   :  { %972 = vmatprep.subr.bf16.mxu1 %v1176_v43 }
  0x5d   :  { %936 = vmatpush3.bf16.msra.mxu0 %v1037_v48 }
  0x5e   :  { %937 = vmatprep.subr.bf16.mxu0 %v1038_v49 }
  0x61   :  { %938 = vmatpush3.bf16.msra.mxu0 %v1039_v50 }
  0x62   :  { %939 = vmatprep.subr.bf16.mxu0 %v1040_v51  ;;  %969 = vmatmul.mubr.msk.bf16.vlgmr.msra.gmra.mrb[4].mxu1 %vm483_vm1, %v83_v0 }
  0x63   :  { %988 = vmatprep.mubr.msk.bf16.mxu1 %vm1177_vm0, %v1176_v43  ;;  %973 = vmatpush3.bf16.msra.mxu1 %v1051_v7 }
  0x64   :  { %974 = vmatprep.subr.bf16.mxu1 %v1176_v43 }
  0x65   :  { %940 = vmatpush3.bf16.msra.mxu0 %v1041_v52 }
  0x66   :  { %941 = vmatprep.subr.bf16.mxu0 %v1042_v53 }
  0x67   :  { %975 = vmatpush3.bf16.msra.mxu1 %v1052_v8 }
  0x68   :  { %976 = vmatprep.subr.bf16.mxu1 %v1176_v43 }
  0x69   :  { %942 = vmatpush3.bf16.msra.mxu0 %v1043_v54 }
  0x6a   :  { %943 = vmatprep.subr.bf16.mxu0 %v1044_v55 }
  0x6b   :  { %977 = vmatpush3.bf16.msra.mxu1 %v1053_v9 }
  0x6c   :  { %978 = vmatprep.subr.bf16.mxu1 %v1176_v43 }
  0x6d   :  { %944 = vmatpush3.bf16.msra.mxu0 %v1045_v58 }
  0x6e   :  { %945 = vmatprep.subr.bf16.mxu0 %v1046_v59 }
  0x6f   :  { %979 = vmatpush3.bf16.msra.mxu1 %v1054_v10 }
  0x70   :  { %980 = vmatprep.subr.bf16.mxu1 %v1176_v43 }
  0x71   :  { %946 = vmatpush3.bf16.msra.mxu0 %v1047_v1 }
  0x72   :  { %947 = vmatprep.subr.bf16.mxu0 %v1048_v2 }
  0x73   :  { %981 = vmatpush3.bf16.msra.mxu1 %v1055_v11 }
  0x74   :  { %982 = vmatprep.subr.bf16.mxu1 %v1176_v43 }
  0x75   :  { %948 = vmatpush3.bf16.msra.mxu0 %v1049_v3 }
  0x77   :  { %983 = vmatpush3.bf16.msra.mxu1 %v1056_v12 }
  0x78   :  { %602 = vmatmul.mubr.bf16.vlgmr.msra.gmra.mrb[4].mxu0 %v81_v6  ;;  %984 = vmatprep.subr.bf16.mxu1 %v1176_v43 }
  0x7b   :  { %985 = vmatpush3.bf16.msra.mxu1 %v1057_v13 }
  0x7c   :  { %986 = vmatprep.subr.bf16.mxu1 %v1176_v43 }
  0x7f   :  { %987 = vmatpush3.bf16.msra.mxu1 %v1058_v14 }
 0x12b   :  { %v905_v15 = vpop.f32.mrb[0].mxu0 }
 0x12c   :  { %v906_v17 = vpop.f32.mrb[1].mxu0 }
 0x12d   :  { %v907_v18 = vadd.f32 %v906_v17, %v905_v15  ;;  %v908_v19 = vpop.f32.mrb[2].mxu0  ;;  %v927_v20 = vpop.f32.mrb[0].mxu1 }
 0x12e   :  { %v909_v21 = vpop.f32.mrb[3].mxu0  ;;  %v928_v24 = vpop.f32.mrb[1].mxu1 }
 0x12f   :  { %v522_v22 = vadd.f32 %v907_v18, %v820_v16  ;;  %v910_v23 = vadd.f32 %v909_v21, %v908_v19  ;;  %v929_v25 = vadd.f32 %v928_v24, %v927_v20  ;;  %v930_v26 = vpop.f32.mrb[2].mxu1 }
 0x130   :  { %v931_v28 = vpop.f32.mrb[3].mxu1 }
 0x131   :  { %v525_v27 = vadd.f32 %v910_v23, %v820_v16  ;;  %v563_v29 = vadd.f32 %v929_v25, %v522_v22  ;;  %v932_v30 = vadd.f32 %v931_v28, %v930_v26 }
 0x133   :  { %v566_v31 = vadd.f32 %v932_v30, %v525_v27 }
 0x135   :  { %v644_v32 = vpop.f32.mrb[4].mxu1 }
 0x136   :  { %v970_v33 = vpop.f32.mrb[5].mxu1 }
 0x137   :  { %v647_v34 = vpop.f32.mrb[6].mxu1 }
 0x138   :  { %v971_v35 = vpop.f32.mrb[7].mxu1 }
 0x14b   :  { %v949_v36 = vpop.f32.mrb[4].mxu0 }
 0x14c   :  { %v950_v37 = vpop.f32.mrb[5].mxu0 }
 0x14d   :  { %v951_v38 = vadd.f32 %v950_v37, %v949_v36  ;;  %v952_v39 = vpop.f32.mrb[6].mxu0 }
 0x14e   :  { %v953_v40 = vpop.f32.mrb[7].mxu0 }
 0x14f   :  { %v604_v41 = vadd.f32 %v951_v38, %v563_v29  ;;  %v954_v42 = vadd.f32 %v953_v40, %v952_v39 }
 0x151   :  { %v645_v43 = vadd.f32 %v644_v32, %v604_v41  ;;  %v607_v44 = vadd.f32 %v954_v42, %v566_v31 }
 0x153   :  { %v651_v45 = vsub.f32 0.0, %v645_v43  ;;  %v648_v46 = vadd.f32 %v647_v34, %v607_v44 }
 0x155   :  { %v653_v47 = vmul.f32 1.442695, %v651_v45  ;;  %v652_v48 = vsub.f32 0.0, %v648_v46 }
 0x157   :  { %1059 = vpow2.f32 %v653_v47  ;;  %v655_v49 = vmul.f32 1.442695, %v652_v48 }
 0x159   :  { %1061 = vpow2.f32 %v655_v49 }
 0x161   :  { %v1060_v50 = vpop.eup %1059 }
 0x162   :  { %v657_v51 = vadd.f32 1.0, %v1060_v50 }
 0x163   :  { %v1062_v52 = vpop.eup %1061 }
 0x164   :  { %v658_v53 = vadd.f32 1.0, %v1062_v52  ;;  %1063 = vrcp.f32 %v657_v51 }
 0x166   :  { %1065 = vrcp.f32 %v658_v53 }
 0x16e   :  { %v1064_v54 = vpop.eup %1063 }
 0x170   :  { %v1066_v55 = vpop.eup %1065 }
 0x171   :  { %v661_v56 = vpack.c.bf16 %v1066_v55, %v1064_v54 }
 0x173   :  { %989 = vmatmul.mubr.bf16.vlgmr.msra.gmra.mrb[8].mxu1 %v661_v56 }
 0x246   :  { %v767_v58 = vpop.f32.mrb[8].mxu1 }
 0x247   :  { %v768_v59 = vadd.f32 %v871_v57, %v767_v58  ;;  %v990_v60 = vpop.f32.mrb[9].mxu1 }
 0x248   :  { %v770_v61 = vpop.f32.mrb[10].mxu1 }
 0x249   :  { %774 = vmax.xlane.f32.xlu0 %v768_v59  ;;  %v991_v62 = vpop.f32.mrb[11].mxu1  ;;  %v771_v63 = vadd.f32 %v871_v57, %v770_v61 }
 0x24d   :  { %776 = vmax.xlane.f32.xlu0 %v771_v63 }
 0x2d6   :  { %v775_v0 = vpop.xlane.xlu0 %774 }
 0x2d7   :  { %v778_v1 = vsub.f32 %v768_v59, %v775_v0 }
 0x2d9   :  { %v780_v2 = vmul.f32 1.442695, %v778_v1 }
 0x2da   :  { %v777_v3 = vpop.xlane.xlu0 %776 }
 0x2db   :  { %1067 = vpow2.f32 %v780_v2  ;;  %v779_v4 = vsub.f32 %v771_v63, %v777_v3 }
 0x2dd   :  { %v782_v5 = vmul.f32 1.442695, %v779_v4 }
 0x2df   :  { %1069 = vpow2.f32 %v782_v5 }
 0x2e5   :  { %v1068_v6 = vpop.eup %1067 }
 0x2e6   :  { %784 = vadd.xlane.f32.xlu1 %v1068_v6 }
 0x2e9   :  { %v1070_v7 = vpop.eup %1069 }
 0x2ea   :  { %786 = vadd.xlane.f32.xlu1 %v1070_v7 }
 0x373   :  { %v785_v8 = vpop.xlane.xlu1 %784 }
 0x374   :  { %1071 = vrcp.f32 %v785_v8 }
 0x377   :  { %v787_v9 = vpop.xlane.xlu1 %786 }
 0x378   :  { %1073 = vrcp.f32 %v787_v9 }
 0x37e   :  { %v1072_v10 = vpop.eup %1071 }
 0x37f   :  { %v789_v12 = vmul.f32 %v1072_v10, %v1068_v6 }
 0x382   :  { %v1074_v11 = vpop.eup %1073 }
 0x383   :  { %v791_v13 = vmul.f32 %v1074_v11, %v1070_v7 }
 0x385   :  { %v887_v14 = vpack.c.bf16 %v791_v13, %v789_v12 }
 0x387   :  { %888 = vst [vmem:[#allocation8] sm:$0xff] %v887_v14  }
 0x388   :  { %1152 = shalt.err (!%p1149_p0)
}
 0x389   :  { %s1153_s14 = scalar_lea.hbm %s1290_s5, 128 }
 0x38a   :  { %p1154_p1 = scmp.ne.s32.totalorder %s1290_s5, %s1153_s14  ;;  %p1157_p2 = scmp.lt.u32.totalorder %s1153_s14, %s1290_s5 }
 0x38c   :  { %p1159_p3 = pnand %p1157_p2, %p1154_p1 }
 0x38e   :  { %1162 = shalt.err (!%p1159_p3)
}
 0x38f   :  { %813 = dma.vmem_to_hbm [thread:$0]  %s808_s10, 128, %s1290_s5, [#allocation4], %s1170_s28, %s1170_s28, %s1171_s29  }
 0x390   :  { %1167 = dma.done.wait [#allocation4], 128  }
 0x391   :  { %1168 = vsyncadd [#allocation4], 4294967168 }
 0x392   :  { %817 = vsyncpa [#allocation3], 1 }
 0x393   :  { %818 = vsyncpa [#allocation6], 1 }
 0x394   :  { %819 = vsyncpa [#allocation4], 1 }

</bundles_post_ra>
